<compile_context>
chip_gen: v7x
topology: tpu7x:2x2x1
jax: 0.10.0
libtpu: 0.0.40
codegen_flags: <defaults>
</compile_context>

<pallas_src>
import functools

import jax
import jax.numpy as jnp
from jax import lax
from jax.experimental import pallas as pl
from jax.experimental.pallas import tpu as pltpu

LANES = 128
TARGET_TILE_ROWS = 4096          # 4096 x 128 f32 = 2 MiB block; pass-2 worst case ~8 MiB

try:
    _VMEM_CAP = int(pltpu.get_tpu_info().vmem_capacity_bytes)
except Exception:                # pragma: no cover - conservative fallback
    _VMEM_CAP = 64 << 20

# Single-pass fast path threshold (input bytes); keep generous headroom for
# double-buffered in + out even under v5e's 16 MiB / v7x's 32 MiB defaults.
FAST_PATH_BYTES = min(_VMEM_CAP // 16, 8 << 20)
FAST_VMEM_LIMIT = int(min(_VMEM_CAP // 2, 48 << 20))


def _round_up(x, m):
    return ((x + m - 1) // m) * m


def _sublane_multiple(dtype):
    itemsize = jnp.dtype(dtype).itemsize
    return {4: 8, 2: 16, 1: 32}.get(itemsize, 8)


# --------------------------------------------------------------------------
# Fast path: whole tensor resident in VMEM; one read, one write, mean fused.
# --------------------------------------------------------------------------
def _fused_kernel(x_ref, o_ref, *, inv_total):
    xf = x_ref[...].astype(jnp.float32)
    mean = jnp.sum(xf) * inv_total
    o_ref[...] = (xf - mean).astype(o_ref.dtype)


# --------------------------------------------------------------------------
# General path, pass 1: partial sums (lane-wide accumulator, ragged-row mask).
# --------------------------------------------------------------------------
def _sum_kernel(x_ref, psum_ref, acc_ref, *, n_inner, tile_rows, n_rows, need_mask):
    i = pl.program_id(1)

    @pl.when(i == 0)
    def _():
        acc_ref[...] = jnp.zeros_like(acc_ref)

    xf = x_ref[...].astype(jnp.float32)
    if need_mask:  # static: only emitted when the last block is ragged
        start = (pl.program_id(0) * n_inner + i) * tile_rows
        row_ids = start + lax.broadcasted_iota(jnp.int32, xf.shape, 0)
        xf = jnp.where(row_ids < n_rows, xf, 0.0)

    # Lane-wide accumulation; defer the cross-lane (XLU) reduce to the end.
    acc_ref[...] += jnp.sum(xf, axis=0, keepdims=True)

    @pl.when(i == n_inner - 1)
    def _():
        psum_ref[0, 0, 0] = jnp.sum(acc_ref[...])


# --------------------------------------------------------------------------
# General path, pass 2: subtract the mean (partials combined in-kernel, SMEM).
# --------------------------------------------------------------------------
def _center_kernel(psum_ref, x_ref, o_ref, *, inv_total, n_partials):
    total_sum = psum_ref[0]
    for p in range(1, n_partials):          # n_partials is a static Python int
        total_sum = total_sum + psum_ref[p]
    mean = total_sum * inv_total
    o_ref[...] = (x_ref[...].astype(jnp.float32) - mean).astype(o_ref.dtype)


def centered_layer(x):
    """x - x.mean() computed with Pallas TPU kernels. Same shape/dtype as x."""
    orig_shape = x.shape
    orig_dtype = x.dtype
    total = x.size
    if total == 0:
        return x
    inv_total = float(1.0 / total)

    # Lane-dense (rows, 128) 2-D view — zero-copy when total % 128 == 0.
    flat = x.reshape(-1)
    padded = (total % LANES) != 0
    if padded:
        # Rare branch: pad only to the next lane multiple (<= 127 elements).
        # TODO(synk): a (leading, last_dim) ragged view would avoid this copy too.
        pad = _round_up(total, LANES) - total
        flat = jnp.concatenate([flat, jnp.zeros((pad,), dtype=orig_dtype)])
    rows = flat.size // LANES
    x2d = flat.reshape(rows, LANES)

    if x2d.size * jnp.dtype(orig_dtype).itemsize <= FAST_PATH_BYTES:
        # ---- Single-pass, VMEM-resident fast path. ----
        out2d = pl.pallas_call(
            functools.partial(_fused_kernel, inv_total=inv_total),
            out_shape=jax.ShapeDtypeStruct((rows, LANES), orig_dtype),
            grid=(1,),
            in_specs=[pl.BlockSpec((rows, LANES), lambda i: (0, 0))],
            out_specs=pl.BlockSpec((rows, LANES), lambda i: (0, 0)),
            compiler_params=pltpu.CompilerParams(
                dimension_semantics=("arbitrary",),
                vmem_limit_bytes=FAST_VMEM_LIMIT),
        )(x2d)
    else:
        # ---- Two-pass path for large tensors. ----
        sub = _sublane_multiple(orig_dtype)
        tile_rows = min(TARGET_TILE_ROWS, _round_up(rows, sub))
        n_blocks = pl.cdiv(rows, tile_rows)
        # 2-way split only where it can pay off (megacore on v7x); it is a
        # harmless serial loop elsewhere now that no padding depends on it.
        splits = 2 if (n_blocks >= 8 and n_blocks % 2 == 0) else 1
        n_inner = n_blocks // splits
        need_mask = (rows % tile_rows) != 0

        # Pass 1: per-split partial sums (f32).
        partial_sums = pl.pallas_call(
            functools.partial(_sum_kernel, n_inner=n_inner, tile_rows=tile_rows,
                              n_rows=rows, need_mask=need_mask),
            out_shape=jax.ShapeDtypeStruct((splits, 1, 1), jnp.float32),
            grid_spec=pltpu.PrefetchScalarGridSpec(
                num_scalar_prefetch=0,
                grid=(splits, n_inner),
                in_specs=[pl.BlockSpec((tile_rows, LANES),
                                       lambda c, i: (c * n_inner + i, 0))],
                out_specs=pl.BlockSpec((1, 1, 1), lambda c, i: (c, 0, 0)),
                scratch_shapes=[pltpu.VMEM((1, LANES), jnp.float32)],
            ),
            compiler_params=pltpu.CompilerParams(
                dimension_semantics=("parallel", "arbitrary")),
        )(x2d)

        # Pass 2: subtract mean; partial sums combined in-kernel from SMEM.
        out2d = pl.pallas_call(
            functools.partial(_center_kernel, inv_total=inv_total,
                              n_partials=splits),
            out_shape=jax.ShapeDtypeStruct((rows, LANES), orig_dtype),
            grid_spec=pltpu.PrefetchScalarGridSpec(
                num_scalar_prefetch=0,
                grid=(n_blocks,),
                in_specs=[
                    pl.BlockSpec(memory_space=pltpu.MemorySpace.SMEM),      # partial sums
                    pl.BlockSpec((tile_rows, LANES), lambda i: (i, 0)),     # x tile
                ],
                out_specs=pl.BlockSpec((tile_rows, LANES), lambda i: (i, 0)),
            ),
            compiler_params=pltpu.CompilerParams(
                dimension_semantics=("parallel",)),
        )(partial_sums.reshape(splits), x2d)

    if padded:
        return out2d.reshape(-1)[:total].reshape(orig_shape)
    return out2d.reshape(orig_shape)


if __name__ == "__main__":
    key = jax.random.PRNGKey(0)

    # Small NCHW input consistent with the PyTorch module (op is layout-agnostic).
    x = jax.random.normal(key, (2, 4, 16, 16), dtype=jnp.float32)
    out = jax.block_until_ready(centered_layer(x))
    ref = x - jnp.mean(x)
    assert out.shape == x.shape and out.dtype == x.dtype
    assert jnp.allclose(out, ref, atol=1e-5, rtol=1e-5)

    # Also exercise the general two-pass path (non-128-aligned total, ragged
    # last block, 2-way reduce split) to validate the large-tensor code path.
    x_big = jax.random.normal(jax.random.PRNGKey(0), (3073, 1250), dtype=jnp.float32)
    out_big = jax.block_until_ready(centered_layer(x_big))
    ref_big = x_big - jnp.mean(x_big)
    assert out_big.shape == x_big.shape and out_big.dtype == x_big.dtype
    assert jnp.allclose(out_big, ref_big, atol=1e-4, rtol=1e-5)

    print("KERNEL_OK")
</pallas_src>

<mosaic_0001>
module attributes {stable_mosaic.version = 11 : i64} {
  func.func @_fused_kernel(%arg0: i32, %arg1: memref<16x128xf32, #tpu.memory_space<vmem>>, %arg2: memref<16x128xf32, #tpu.memory_space<vmem>>) attributes {dimension_semantics = [#tpu.dimension_semantics<arbitrary>], iteration_bounds = array<i64: 1>, scalar_prefetch = 0 : i64, scratch_operands = 0 : i64, tpu.core_type = #tpu.core_type<tc>, window_params = [{pipeline_mode = #tpu.pipeline_mode<synchronous>, transform_indices = @transform_0, window_bounds = array<i64: 16, 128>}, {pipeline_mode = #tpu.pipeline_mode<synchronous>, transform_indices = @transform_1, window_bounds = array<i64: 16, 128>}]} {
    %c0 = arith.constant 0 : index
    %c0_0 = arith.constant 0 : index
    %0 = vector.load %arg1[%c0, %c0_0] : memref<16x128xf32, #tpu.memory_space<vmem>>, vector<16x128xf32>
    %1 = vector.shape_cast %0 : vector<16x128xf32> to vector<1x16x128xf32>
    %cst = arith.constant dense<0.000000e+00> : vector<1xf32>
    %2 = vector.multi_reduction <add>, %1, %cst [1, 2] : vector<1x16x128xf32> to vector<1xf32>
    %3 = vector.shape_cast %2 : vector<1xf32> to vector<1x1x1xf32>
    %4 = vector.extract %3[0, 0, 0] : f32 from vector<1x1x1xf32>
    %cst_1 = arith.constant 4.8828125E-4 : f32
    %5 = arith.mulf %4, %cst_1 : f32
    %6 = vector.broadcast %5 : f32 to vector<16x128xf32>
    %7 = arith.subf %0, %6 : vector<16x128xf32>
    %c0_2 = arith.constant 0 : index
    %c0_3 = arith.constant 0 : index
    %8 = vector.load %arg2[%c0_2, %c0_3] : memref<16x128xf32, #tpu.memory_space<vmem>>, vector<16x128xf32>
    tpu.vector_store %arg2[%c0_2, %c0_3], %7 {strides = array<i32>} : memref<16x128xf32, #tpu.memory_space<vmem>>, vector<16x128xf32>,
    return
  }
  func.func @transform_0(%arg0: i32) -> (i32, i32) {
    %c0_i32 = arith.constant 0 : i32
    %c0_i32_0 = arith.constant 0 : i32
    %c0_i32_1 = arith.constant 0 : i32
    return %c0_i32, %c0_i32_0 : i32, i32
  }
  func.func @transform_1(%arg0: i32) -> (i32, i32) {
    %c0_i32 = arith.constant 0 : i32
    %c0_i32_0 = arith.constant 0 : i32
    %c0_i32_1 = arith.constant 0 : i32
    return %c0_i32, %c0_i32_0 : i32, i32
  }
}

</mosaic_0001>

<bundles_post_ra>
// kernel: tpu_custom_call.1
= control target key start
LH: loop header
LB: loop body
LE: loop exit
PB: predicated region body
PF: predicated region fallthrough
CT: control target
= control target key end

     0   :  { %6 = vsyncpa [#allocation3], 0  ;;  %s156_s0 = inlined_call_operand.hbm [shape: f32[16,128], index: 0, kind: input, shape index: {}]   ;;  %s157_s1 = inlined_call_operand.hbm [shape: f32[16,128], index: 1, kind: output, shape index: {}]  }
   0x1   :  { %7 = vsyncpa [#allocation4], 0  ;;  %s112_s6 = smov [#allocation2]   ;;  %s64_s10 = scalar_lea.hbm %s156_s0, 256 }
   0x2   :  { %s13_s7 = sshll.u32 %s112_s6, 4  ;;  %p65_p0 = scmp.ne.s32.totalorder %s156_s0, %s64_s10  ;;  %s14_s7 = int_to_ptr.vmem [resolvable:$true] %s13_s7 }
   0x3   :  { %p68_p1 = scmp.lt.u32.totalorder %s64_s10, %s156_s0 }
   0x5   :  { %p70_p2 = pnand %p68_p1, %p65_p0 }
   0x7   :  { %73 = shalt.err (!%p70_p2)
}
   0x8   :  { %s74_s15 = scalar_lea.vmem %s14_s7, 256  ;;  %p79_p4 = scmp.lt.s32.totalorder %s14_s7, %s14_s7 }
   0x9   :  { %p75_p3 = scmp.ne.s32.totalorder %s14_s7, %s74_s15  ;;  %p80_p5 = scmp.lt.s32.totalorder %s74_s15, %s74_s15 }
   0xb   :  { %p81_p6 = por %p80_p5, %p79_p4 }
   0xd   :  { %p82_p7 = pnand %p81_p6, %p75_p3 }
   0xf   :  { %85 = shalt.err (!%p82_p7)
}
  0x10   :  { %s113_s16 = smov 128   ;;  %s114_s17 = smov 8  }
  0x11   :  { %19 = dma.hbm_to_vmem [thread:$0]  %s156_s0, 256, %s14_s7, [#allocation3], %s113_s16, %s113_s16, %s114_s17  }
  0x12   :  { %108 = dma.done.wait [#allocation3], 256  }
  0x13   :  { %109 = vsyncadd [#allocation3], 4294967040  ;;  %v23_v0 = vld [vmem:[#allocation2] sm:$0xff]  ;;  %v24_v1 = vld [vmem:[#allocation2 + $0x8] sm:$0xff]  ;;  %s115_s22 = smov [#allocation5]  }
  0x14   :  { %v25_v2 = vadd.f32 %v24_v1, %v23_v0  ;;  %s46_s23 = sshll.u32 %s115_s22, 4  ;;  %s47_s23 = int_to_ptr.vmem [resolvable:$true] %s46_s23 }
  0x15   :  { %s86_s0 = scalar_lea.vmem %s47_s23, 256  ;;  %p91_p9 = scmp.lt.s32.totalorder %s47_s23, %s47_s23 }
  0x16   :  { %26 = vadd.xlane.f32.xlu0 %v25_v2  ;;  %p87_p8 = scmp.ne.s32.totalorder %s47_s23, %s86_s0  ;;  %p92_p10 = scmp.lt.s32.totalorder %s86_s0, %s86_s0 }
  0x18   :  { %p93_p11 = por %p92_p10, %p91_p9 }
  0x1a   :  { %p94_p12 = pnand %p93_p11, %p87_p8 }
  0xa3   :  { %v27_v3 = vpop.xlane.xlu0 %26 }
  0xa4   :  { %v28_v4 = vrot.slane %v27_v3, 4 }
  0xa6   :  { %v29_v5 = vadd.f32 %v28_v4, %v27_v3 }
  0xa8   :  { %v30_v6 = vrot.slane %v29_v5, 2 }
  0xaa   :  { %v31_v7 = vadd.f32 %v30_v6, %v29_v5 }
  0xac   :  { %v32_v8 = vrot.slane %v31_v7, 1 }
  0xae   :  { %v33_v9 = vadd.f32 %v32_v8, %v31_v7 }
  0xb0   :  { %58 = vpush %v33_v9 }
  0xe1   :  { %s59_s20 = spop %58 }
  0xe2   :  { %s35_s21 = smul.f32 0.00048828125, %s59_s20 }
  0xe4   :  { %v36_v10 = vstv %s35_s21 }
  0xe5   :  { %v37_v11 = vsub.f32 %v23_v0, %v36_v10  ;;  %v38_v12 = vsub.f32 %v24_v1, %v36_v10 }
  0xe7   :  { %39 = vst [vmem:[#allocation5] sm:$0xff] %v37_v11  ;;  %40 = vst [vmem:[#allocation5 + $0x8] sm:$0xff] %v38_v12 }
  0xe8   :  { %97 = shalt.err (!%p94_p12)
}
  0xe9   :  { %s98_s26 = scalar_lea.hbm %s157_s1, 256 }
  0xea   :  { %p99_p13 = scmp.ne.s32.totalorder %s157_s1, %s98_s26  ;;  %p102_p0 = scmp.lt.u32.totalorder %s98_s26, %s157_s1 }
  0xec   :  { %p104_p1 = pnand %p102_p0, %p99_p13 }
  0xee   :  { %107 = shalt.err (!%p104_p1)
}
  0xef   :  { %52 = dma.vmem_to_hbm [thread:$0]  %s47_s23, 256, %s157_s1, [#allocation4], %s113_s16, %s113_s16, %s114_s17  }
  0xf0   :  { %110 = dma.done.wait [#allocation4], 256  }
  0xf1   :  { %111 = vsyncadd [#allocation4], 4294967040 }
  0xf2   :  { %56 = vsyncpa [#allocation3], 1 }
  0xf3   :  { %57 = vsyncpa [#allocation4], 1 }

</bundles_post_ra>
